<compile_context>
chip_gen: v5e
topology: v5e:2x2
jax: 0.10.0
libtpu: 0.0.40
codegen_flags: <defaults>
</compile_context>

<pallas_src>
import functools
import math

import jax
import jax.numpy as jnp
from jax.experimental import pallas as pl
from jax.experimental.pallas import tpu as pltpu


def _round_up(n: int, m: int) -> int:
    return ((n + m - 1) // m) * m


def _mlp_kernel(x_ref, *refs, layer_flags):
    """Fused MLP forward for one batch tile.

    refs = (w_0, b_0, w_1, b_1, ..., w_{L-1}, b_{L-1}, o_ref)
      w_l : [d_in_pad_l, d_out_pad_l]   (bf16, VMEM-resident)
      b_l : [1, d_out_pad_l]            (f32)
    Activations stay in f32 inside the kernel; only the dot operands are bf16.
    """
    o_ref = refs[-1]
    h = x_ref[...].astype(jnp.float32)
    for i, (skip, relu) in enumerate(layer_flags):
        w = refs[2 * i][...]
        b = refs[2 * i + 1][...].astype(jnp.float32)
        # MXU matmul: bf16 operands, f32 accumulation.
        y = jnp.dot(h.astype(w.dtype), w, preferred_element_type=jnp.float32) + b
        if skip:
            # PyTorch: x = x + fc(x), BEFORE the activation.
            y = y + h
        if relu:
            y = jnp.maximum(y, 0.0)
        h = y
    o_ref[...] = h.astype(o_ref.dtype)


class BasicMLP:
    """JAX/Pallas port of spinup.utils.basic_mlp.BasicMLP (ReLU activation)."""

    def __init__(self, input_dim, output_dim, hidden_dims, skip_connection=False,
                 key=jax.random.PRNGKey(0), param_dtype=jnp.float32,
                 compute_dtype=jnp.bfloat16):
        self.input_dim = int(input_dim)
        self.output_dim = int(output_dim)
        self.hidden_dims = list(hidden_dims)
        self.skip_connection = bool(skip_connection)

        dims = [self.input_dim] + self.hidden_dims + [self.output_dim]
        dims_pad = [_round_up(d, 128) for d in dims]   # lane-dense feature dims
        self.dims = dims
        self.dims_pad = dims_pad

        self.weights = []      # padded, bf16, stored transposed as [in, out]
        self.biases = []       # padded, f32, shape [1, out]
        self.layer_flags = []  # (skip, relu) per layer, static

        n_layers = len(dims) - 1
        for i in range(n_layers):
            fan_in, fan_out = dims[i], dims[i + 1]
            key, kw, kb = jax.random.split(key, 3)
            bound = 1.0 / math.sqrt(fan_in)
            # PyTorch nn.Linear default init: U(-1/sqrt(fan_in), 1/sqrt(fan_in)).
            w = jax.random.uniform(kw, (fan_in, fan_out), param_dtype, -bound, bound)
            b = jax.random.uniform(kb, (fan_out,), param_dtype, -bound, bound)

            w_pad = jnp.zeros((dims_pad[i], dims_pad[i + 1]), compute_dtype)
            w_pad = w_pad.at[:fan_in, :fan_out].set(w.astype(compute_dtype))
            b_pad = jnp.zeros((1, dims_pad[i + 1]), jnp.float32)
            b_pad = b_pad.at[0, :fan_out].set(b.astype(jnp.float32))

            self.weights.append(w_pad)
            self.biases.append(b_pad)
            skip = self.skip_connection and (fan_in == fan_out)
            relu = i < n_layers - 1
            self.layer_flags.append((skip, relu))

    def __call__(self, x):
        B, d_in = x.shape
        assert d_in == self.input_dim, (d_in, self.input_dim)
        d_in_pad = self.dims_pad[0]
        d_out_pad = self.dims_pad[-1]

        # Batch tiling: multiple of 8, capped at 512 rows per tile.
        tile_b = min(512, _round_up(B, 8))
        B_pad = _round_up(B, tile_b)

        x_pad = jnp.zeros((B_pad, d_in_pad), x.dtype).at[:B, :d_in].set(x)

        kernel = functools.partial(_mlp_kernel, layer_flags=tuple(self.layer_flags))

        in_specs = [pl.BlockSpec((tile_b, d_in_pad), lambda i: (i, 0))]
        for w, b in zip(self.weights, self.biases):
            # Constant block index -> weight/bias stay resident across the grid.
            in_specs.append(pl.BlockSpec(w.shape, lambda i: (0, 0)))
            in_specs.append(pl.BlockSpec(b.shape, lambda i: (0, 0)))
        out_spec = pl.BlockSpec((tile_b, d_out_pad), lambda i: (i, 0))

        # Advisory cost estimate for XLA scheduling.
        flops = 2 * B_pad * sum(w.shape[0] * w.shape[1] for w in self.weights)
        bytes_accessed = (
            x_pad.size * x_pad.dtype.itemsize
            + B_pad * d_out_pad * x.dtype.itemsize
            + sum(w.size * w.dtype.itemsize for w in self.weights)
            + sum(b.size * b.dtype.itemsize for b in self.biases)
        )

        # Rough VMEM requirement: resident params + double-buffered x/out tiles
        # + f32 intermediate activations.  Only raise the limit if needed; cap
        # at 64 MiB (v7x physical VMEM).
        param_bytes = (sum(w.size * w.dtype.itemsize for w in self.weights)
                       + sum(b.size * b.dtype.itemsize for b in self.biases))
        tile_bytes = 2 * (tile_b * d_in_pad + tile_b * d_out_pad) * 4
        interm_bytes = 2 * tile_b * max(self.dims_pad) * 4
        vmem_est = param_bytes + tile_bytes + interm_bytes
        vmem_limit = None
        if 2 * vmem_est > 32 * 1024 * 1024:
            vmem_limit = int(min(64 * 1024 * 1024, 2 * vmem_est))

        out = pl.pallas_call(
            kernel,
            out_shape=jax.ShapeDtypeStruct((B_pad, d_out_pad), x.dtype),
            grid=(B_pad // tile_b,),
            in_specs=in_specs,
            out_specs=out_spec,
            compiler_params=pltpu.CompilerParams(
                dimension_semantics=("parallel",),
                vmem_limit_bytes=vmem_limit,
            ),
            cost_estimate=pl.CostEstimate(
                flops=flops, transcendentals=0, bytes_accessed=bytes_accessed),
        )(x_pad, *[p for wb in zip(self.weights, self.biases) for p in wb])

        return out[:B, :self.output_dim]

    # Pure-JAX reference mirroring the kernel math (bf16 dot, f32 epilogue).
    def reference(self, x):
        B, d_in = x.shape
        h = jnp.zeros((B, self.dims_pad[0]), jnp.float32).at[:, :d_in].set(
            x.astype(jnp.float32))
        for (w, b), (skip, relu) in zip(zip(self.weights, self.biases),
                                        self.layer_flags):
            y = jnp.dot(h.astype(w.dtype), w,
                        preferred_element_type=jnp.float32) + b.astype(jnp.float32)
            if skip:
                y = y + h
            if relu:
                y = jnp.maximum(y, 0.0)
            h = y
        return h[:, :self.output_dim].astype(x.dtype)


if __name__ == "__main__":
    batch = 8
    input_dim = 16
    hidden_dims = (32, 32)   # equal hidden dims so skip_connection actually fires
    output_dim = 8

    key = jax.random.PRNGKey(0)
    k_x, k_params = jax.random.split(key)
    x = jax.random.normal(k_x, (batch, input_dim), jnp.float32)

    mlp = BasicMLP(input_dim, output_dim, hidden_dims,
                   skip_connection=True, key=k_params)

    out = jax.block_until_ready(mlp(x))
    ref = jax.block_until_ready(mlp.reference(x))

    assert out.shape == (batch, output_dim), out.shape
    assert jnp.all(jnp.isfinite(out))
    assert float(jnp.max(jnp.abs(out - ref))) < 1e-3, float(jnp.max(jnp.abs(out - ref)))
    print("KERNEL_OK")
</pallas_src>

<mosaic_0001>
module attributes {stable_mosaic.version = 11 : i64} {
  func.func @_mlp_kernel(%arg0: i32, %arg1: memref<8x128xf32, #tpu.memory_space<vmem>>, %arg2: memref<128x128xbf16, #tpu.memory_space<vmem>>, %arg3: memref<1x128xf32, #tpu.memory_space<vmem>>, %arg4: memref<128x128xbf16, #tpu.memory_space<vmem>>, %arg5: memref<1x128xf32, #tpu.memory_space<vmem>>, %arg6: memref<128x128xbf16, #tpu.memory_space<vmem>>, %arg7: memref<1x128xf32, #tpu.memory_space<vmem>>, %arg8: memref<8x128xf32, #tpu.memory_space<vmem>>) attributes {dimension_semantics = [#tpu.dimension_semantics<parallel>], iteration_bounds = array<i64: 1>, scalar_prefetch = 0 : i64, scratch_operands = 0 : i64, tpu.core_type = #tpu.core_type<tc>, window_params = [{transform_indices = @transform_0, window_bounds = array<i64: 8, 128>}, {pipeline_mode = #tpu.pipeline_mode<synchronous>, transform_indices = @transform_1, window_bounds = array<i64: 128, 128>}, {pipeline_mode = #tpu.pipeline_mode<synchronous>, transform_indices = @transform_2, window_bounds = array<i64: 1, 128>}, {pipeline_mode = #tpu.pipeline_mode<synchronous>, transform_indices = @transform_3, window_bounds = array<i64: 128, 128>}, {pipeline_mode = #tpu.pipeline_mode<synchronous>, transform_indices = @transform_4, window_bounds = array<i64: 1, 128>}, {pipeline_mode = #tpu.pipeline_mode<synchronous>, transform_indices = @transform_5, window_bounds = array<i64: 128, 128>}, {pipeline_mode = #tpu.pipeline_mode<synchronous>, transform_indices = @transform_6, window_bounds = array<i64: 1, 128>}, {transform_indices = @transform_7, window_bounds = array<i64: 8, 128>}]} {
    %c0 = arith.constant 0 : index
    %c0_0 = arith.constant 0 : index
    %0 = vector.load %arg1[%c0, %c0_0] : memref<8x128xf32, #tpu.memory_space<vmem>>, vector<8x128xf32>
    %c0_1 = arith.constant 0 : index
    %c0_2 = arith.constant 0 : index
    %1 = vector.load %arg2[%c0_1, %c0_2] : memref<128x128xbf16, #tpu.memory_space<vmem>>, vector<128x128xbf16>
    %c0_3 = arith.constant 0 : index
    %c0_4 = arith.constant 0 : index
    %2 = vector.load %arg3[%c0_3, %c0_4] : memref<1x128xf32, #tpu.memory_space<vmem>>, vector<1x128xf32>
    %3 = arith.truncf %0 : vector<8x128xf32> to vector<8x128xbf16>
    %cst = arith.constant dense<0.000000e+00> : vector<8x128xf32>
    %4 = tpu.matmul %3, %1, %cst {dimension_numbers = #tpu.dot_dimension_numbers<[1], [0], [0], [1], [0, 0, 1, 1], [], []>} : vector<8x128xbf16>, vector<128x128xbf16>, vector<8x128xf32> -> vector<8x128xf32>
    %5 = vector.broadcast %2 : vector<1x128xf32> to vector<8x128xf32>
    %6 = arith.addf %4, %5 : vector<8x128xf32>
    %cst_5 = arith.constant 0.000000e+00 : f32
    %7 = vector.broadcast %cst_5 : f32 to vector<8x128xf32>
    %8 = arith.maximumf %6, %7 : vector<8x128xf32>
    %c0_6 = arith.constant 0 : index
    %c0_7 = arith.constant 0 : index
    %9 = vector.load %arg4[%c0_6, %c0_7] : memref<128x128xbf16, #tpu.memory_space<vmem>>, vector<128x128xbf16>
    %c0_8 = arith.constant 0 : index
    %c0_9 = arith.constant 0 : index
    %10 = vector.load %arg5[%c0_8, %c0_9] : memref<1x128xf32, #tpu.memory_space<vmem>>, vector<1x128xf32>
    %11 = arith.truncf %8 : vector<8x128xf32> to vector<8x128xbf16>
    %cst_10 = arith.constant dense<0.000000e+00> : vector<8x128xf32>
    %12 = tpu.matmul %11, %9, %cst_10 {dimension_numbers = #tpu.dot_dimension_numbers<[1], [0], [0], [1], [0, 0, 1, 1], [], []>} : vector<8x128xbf16>, vector<128x128xbf16>, vector<8x128xf32> -> vector<8x128xf32>
    %13 = vector.broadcast %10 : vector<1x128xf32> to vector<8x128xf32>
    %14 = arith.addf %12, %13 : vector<8x128xf32>
    %15 = arith.addf %14, %8 : vector<8x128xf32>
    %cst_11 = arith.constant 0.000000e+00 : f32
    %16 = vector.broadcast %cst_11 : f32 to vector<8x128xf32>
    %17 = arith.maximumf %15, %16 : vector<8x128xf32>
    %c0_12 = arith.constant 0 : index
    %c0_13 = arith.constant 0 : index
    %18 = vector.load %arg6[%c0_12, %c0_13] : memref<128x128xbf16, #tpu.memory_space<vmem>>, vector<128x128xbf16>
    %c0_14 = arith.constant 0 : index
    %c0_15 = arith.constant 0 : index
    %19 = vector.load %arg7[%c0_14, %c0_15] : memref<1x128xf32, #tpu.memory_space<vmem>>, vector<1x128xf32>
    %20 = arith.truncf %17 : vector<8x128xf32> to vector<8x128xbf16>
    %cst_16 = arith.constant dense<0.000000e+00> : vector<8x128xf32>
    %21 = tpu.matmul %20, %18, %cst_16 {dimension_numbers = #tpu.dot_dimension_numbers<[1], [0], [0], [1], [0, 0, 1, 1], [], []>} : vector<8x128xbf16>, vector<128x128xbf16>, vector<8x128xf32> -> vector<8x128xf32>
    %22 = vector.broadcast %19 : vector<1x128xf32> to vector<8x128xf32>
    %23 = arith.addf %21, %22 : vector<8x128xf32>
    %c0_17 = arith.constant 0 : index
    %c0_18 = arith.constant 0 : index
    %24 = vector.load %arg8[%c0_17, %c0_18] : memref<8x128xf32, #tpu.memory_space<vmem>>, vector<8x128xf32>
    tpu.vector_store %arg8[%c0_17, %c0_18], %23 {strides = array<i32>} : memref<8x128xf32, #tpu.memory_space<vmem>>, vector<8x128xf32>,
    return
  }
  func.func @transform_0(%arg0: i32) -> (i32, i32) {
    %c0_i32 = arith.constant 0 : i32
    %c0_i32_0 = arith.constant 0 : i32
    return %arg0, %c0_i32 : i32, i32
  }
  func.func @transform_1(%arg0: i32) -> (i32, i32) {
    %c0_i32 = arith.constant 0 : i32
    %c0_i32_0 = arith.constant 0 : i32
    %c0_i32_1 = arith.constant 0 : i32
    return %c0_i32, %c0_i32_0 : i32, i32
  }
  func.func @transform_2(%arg0: i32) -> (i32, i32) {
    %c0_i32 = arith.constant 0 : i32
    %c0_i32_0 = arith.constant 0 : i32
    %c0_i32_1 = arith.constant 0 : i32
    return %c0_i32, %c0_i32_0 : i32, i32
  }
  func.func @transform_3(%arg0: i32) -> (i32, i32) {
    %c0_i32 = arith.constant 0 : i32
    %c0_i32_0 = arith.constant 0 : i32
    %c0_i32_1 = arith.constant 0 : i32
    return %c0_i32, %c0_i32_0 : i32, i32
  }
  func.func @transform_4(%arg0: i32) -> (i32, i32) {
    %c0_i32 = arith.constant 0 : i32
    %c0_i32_0 = arith.constant 0 : i32
    %c0_i32_1 = arith.constant 0 : i32
    return %c0_i32, %c0_i32_0 : i32, i32
  }
  func.func @transform_5(%arg0: i32) -> (i32, i32) {
    %c0_i32 = arith.constant 0 : i32
    %c0_i32_0 = arith.constant 0 : i32
    %c0_i32_1 = arith.constant 0 : i32
    return %c0_i32, %c0_i32_0 : i32, i32
  }
  func.func @transform_6(%arg0: i32) -> (i32, i32) {
    %c0_i32 = arith.constant 0 : i32
    %c0_i32_0 = arith.constant 0 : i32
    %c0_i32_1 = arith.constant 0 : i32
    return %c0_i32, %c0_i32_0 : i32, i32
  }
  func.func @transform_7(%arg0: i32) -> (i32, i32) {
    %c0_i32 = arith.constant 0 : i32
    %c0_i32_0 = arith.constant 0 : i32
    return %arg0, %c0_i32 : i32, i32
  }
}

</mosaic_0001>

<bundles_post_ra>
// kernel: tpu_custom_call.1
= control target key start
LH: loop header
LB: loop body
LE: loop exit
PB: predicated region body
PF: predicated region fallthrough
CT: control target
= control target key end

     0   :  { %12 = vsyncpa [#allocation3], 0  ;;  %s687_s0 = inlined_call_operand.hbm [shape: f32[8,128], index: 0, kind: input, shape index: {}]   ;;  %s688_s1 = inlined_call_operand.hbm [shape: bf16[128,128], index: 1, kind: input, shape index: {}]   ;;  %s689_s2 = inlined_call_operand.vmem [shape: f32[1,128], index: 2, kind: input, shape index: {}]   ;;  %s690_s3 = inlined_call_operand.hbm [shape: bf16[128,128], index: 3, kind: input, shape index: {}]   ;;  %s691_s4 = inlined_call_operand.vmem [shape: f32[1,128], index: 4, kind: input, shape index: {}]   ;;  %s692_s5 = inlined_call_operand.hbm [shape: bf16[128,128], index: 5, kind: input, shape index: {}]   ;;  %s693_s6 = inlined_call_operand.vmem [shape: f32[1,128], index: 6, kind: input, shape index: {}]   ;;  %s694_s7 = inlined_call_operand.hbm [shape: f32[8,128], index: 7, kind: output, shape index: {}]  }
   0x1   :  { %13 = vsyncpa [#allocation6], 0 }
   0x2   :  { %14 = vsyncpa [#allocation9], 0  ;;  %s31_s26 = sshll.u32 %s688_s1, 4  ;;  %s32_s26 = int_to_ptr.hbm [resolvable:$true] %s31_s26 }
   0x3   :  { %15 = vsyncpa [#allocation4], 0  ;;  %s616_s27 = smov [#allocation5]   ;;  %s21_s8 = sshll.u32 %s687_s0, 4  ;;  %s22_s8 = int_to_ptr.hbm [resolvable:$true] %s21_s8 }
   0x4   :  { %s33_s28 = sshll.u32 %s616_s27, 4  ;;  %s617_s9 = smov 64   ;;  %s34_s28 = int_to_ptr.vmem [resolvable:$true] %s33_s28 }
   0x5   :  { %s618_s10 = smov 4   ;;  %s619_s11 = smov [#allocation2]  }
   0x6   :  { %39 = dma.hbm_to_vmem [thread:$0]  %s32_s26, 1024, %s34_s28, [#allocation6], %s617_s9, %s617_s9, %s618_s10  }
   0x7   :  { %s23_s12 = sshll.u32 %s619_s11, 4  ;;  %s46_s15 = sshll.u32 %s690_s3, 4  ;;  %s24_s12 = int_to_ptr.vmem [resolvable:$true] %s23_s12  ;;  %s47_s15 = int_to_ptr.hbm [resolvable:$true] %s46_s15 }
   0x8   :  { %26 = dma.hbm_to_vmem [thread:$0]  %s22_s8, 128, %s24_s12, [#allocation3]  }
   0x9   :  { %s61_s17 = sshll.u32 %s692_s5, 4  ;;  %s620_s18 = smov [#allocation7]   ;;  %s62_s17 = int_to_ptr.hbm [resolvable:$true] %s61_s17 }
   0xa   :  { %s48_s19 = sshll.u32 %s620_s18, 4  ;;  %s621_s0 = smov [#allocation8]   ;;  %s49_s19 = int_to_ptr.vmem [resolvable:$true] %s48_s19 }
   0xb   :  { %54 = dma.hbm_to_vmem [thread:$0]  %s47_s15, 1024, %s49_s19, [#allocation6], %s617_s9, %s617_s9, %s618_s10  }
   0xc   :  { %s63_s20 = sshll.u32 %s621_s0, 4  ;;  %s64_s20 = int_to_ptr.vmem [resolvable:$true] %s63_s20 }
   0xd   :  { %69 = dma.hbm_to_vmem [thread:$0]  %s62_s17, 1024, %s64_s20, [#allocation9], %s617_s9, %s617_s9, %s618_s10  }
   0xe   :  { %608 = dma.done.wait [#allocation3], 128  }
   0xf   :  { %609 = vsyncadd [#allocation3], 4294967168 }
  0x10   :  { %610 = dma.done.wait [#allocation6], 2048  }
  0x11   :  { %611 = vsyncadd [#allocation6], 4294965248 }
  0x12   :  { %612 = dma.done.wait [#allocation9], 1024  }
  0x13   :  { %613 = vsyncadd [#allocation9], 4294966272  ;;  %v461_v0 = vld [vmem:[#allocation5 + $0x38] sm:$0xff]  ;;  %v460_v1 = vld [vmem:[#allocation5 + $0x30] sm:$0xff]  ;;  %s622_s24 = smov [#allocation10]   ;;  %s346_s28 = sshll.u32 %s694_s7, 4  ;;  %s347_s28 = int_to_ptr.hbm [resolvable:$true] %s346_s28 }
  0x14   :  { %158 = vmatpush.bf16.msra.mxu0 %v461_v0  ;;  %v469_v2 = vld [vmem:[#allocation7 + $0x38] sm:$0xff]  ;;  %v468_v3 = vld [vmem:[#allocation7 + $0x30] sm:$0xff]  ;;  %v459_v4 = vld [vmem:[#allocation5 + $0x28] sm:$0xff]  ;;  %s344_s25 = sshll.u32 %s622_s24, 4  ;;  %s345_s25 = int_to_ptr.vmem [resolvable:$true] %s344_s25 }
  0x15   :  { %241 = vmatpush.bf16.msra.mxu1 %v469_v2  ;;  %v467_v5 = vld [vmem:[#allocation7 + $0x28] sm:$0xff]  ;;  %v458_v6 = vld [vmem:[#allocation5 + $0x20] sm:$0xff]  ;;  %v457_v8 = vld [vmem:[#allocation5 + $0x18] sm:$0xff] }
  0x16   :  { %v466_v7 = vld [vmem:[#allocation7 + $0x20] sm:$0xff]  ;;  %v465_v9 = vld [vmem:[#allocation7 + $0x18] sm:$0xff]  ;;  %v456_v10 = vld [vmem:[#allocation5 + $0x10] sm:$0xff] }
  0x17   :  { %v464_v11 = vld [vmem:[#allocation7 + $0x10] sm:$0xff]  ;;  %v455_v12 = vld [vmem:[#allocation5 + $0x8] sm:$0xff]  ;;  %v454_v13 = vld [vmem:[#allocation5] sm:$0xff] }
  0x18   :  { %159 = vmatpush.bf16.msra.mxu0 %v460_v1  ;;  %v88_v14 = vld [vmem:[#allocation2] sm:$0xff]  ;;  %v463_v16 = vld [vmem:[#allocation7 + $0x8] sm:$0xff]  ;;  %v462_v17 = vld [vmem:[#allocation7] sm:$0xff] }
  0x19   :  { %242 = vmatpush.bf16.msra.mxu1 %v468_v3  ;;  %v106_v15 = vpack.c.bf16 %v88_v14, %v88_v14  ;;  %v477_v18 = vld [vmem:[#allocation8 + $0x38] sm:$0xff]  ;;  %v476_v19 = vld [vmem:[#allocation8 + $0x30] sm:$0xff]  ;;  %v475_v20 = vld [vmem:[#allocation8 + $0x28] sm:$0xff] }
  0x1a   :  { %325 = vmatpush.bf16.msra.mxu2 %v477_v18  ;;  %v474_v21 = vld [vmem:[#allocation8 + $0x20] sm:$0xff]  ;;  %v473_v22 = vld [vmem:[#allocation8 + $0x18] sm:$0xff]  ;;  %v472_v23 = vld [vmem:[#allocation8 + $0x10] sm:$0xff] }
  0x1b   :  { %v485_v24 = vld [vmem:[%s689_s2] ss:$0 sm:$0xff]  ;;  %v471_v30 = vld [vmem:[#allocation8 + $0x8] sm:$0xff]  ;;  %v470_v31 = vld [vmem:[#allocation8] sm:$0xff] }
  0x1c   :  { %160 = vmatpush.bf16.msra.mxu0 %v459_v4  ;;  %v486_v32 = vld [vmem:[%s691_s4] ss:$0 sm:$0xff] }
  0x1d   :  { %243 = vmatpush.bf16.msra.mxu1 %v467_v5  ;;  %v487_v39 = vld [vmem:[%s693_s6] ss:$0 sm:$0xff] }
  0x1e   :  { %326 = vmatpush.bf16.msra.mxu2 %v476_v19 }
  0x20   :  { %161 = vmatpush.bf16.msra.mxu0 %v458_v6 }
  0x21   :  { %244 = vmatpush.bf16.msra.mxu1 %v466_v7 }
  0x22   :  { %327 = vmatpush.bf16.msra.mxu2 %v475_v20 }
  0x24   :  { %162 = vmatpush.bf16.msra.mxu0 %v457_v8 }
  0x25   :  { %245 = vmatpush.bf16.msra.mxu1 %v465_v9 }
  0x26   :  { %328 = vmatpush.bf16.msra.mxu2 %v474_v21 }
  0x28   :  { %163 = vmatpush.bf16.msra.mxu0 %v456_v10 }
  0x29   :  { %246 = vmatpush.bf16.msra.mxu1 %v464_v11 }
  0x2a   :  { %329 = vmatpush.bf16.msra.mxu2 %v473_v22 }
  0x2c   :  { %164 = vmatpush.bf16.msra.mxu0 %v455_v12 }
  0x2d   :  { %247 = vmatpush.bf16.msra.mxu1 %v463_v16 }
  0x2e   :  { %330 = vmatpush.bf16.msra.mxu2 %v472_v23 }
  0x30   :  { %165 = vmatpush.bf16.msra.mxu0 %v454_v13 }
  0x31   :  { %248 = vmatpush.bf16.msra.mxu1 %v462_v17 }
  0x32   :  { %331 = vmatpush.bf16.msra.mxu2 %v471_v30 }
  0x33   :  { %166 = vmatmul.bf16.vlgmr.msra.gmra.mxu0 %v106_v15 }
  0x36   :  { %332 = vmatpush.bf16.msra.mxu2 %v470_v31 }
  0xb0   :  { %v167_v25 = vpop.f32.mrf.mxu0 }
  0xb1   :  { %v168_v26 = vadd.f32 %v485_v24, %v167_v25 }
  0xb3   :  { %v171_v27 = vmax.f32 %v168_v26, 0.0 }
  0xb5   :  { %v189_v28 = vpack.c.bf16 %v171_v27, %v171_v27 }
  0xb7   :  { %249 = vmatmul.bf16.vlgmr.msra.gmra.mxu1 %v189_v28 }
  0xb8   :  { %v169_v29 = vpop.f32.mrf.mxu0 }
 0x134   :  { %v250_v33 = vpop.f32.mrf.mxu1 }
 0x135   :  { %v251_v34 = vadd.f32 %v486_v32, %v250_v33 }
 0x137   :  { %v254_v35 = vadd.f32 %v251_v34, %v171_v27 }
 0x139   :  { %v255_v36 = vmax.f32 %v254_v35, 0.0 }
 0x13b   :  { %v273_v37 = vpack.c.bf16 %v255_v36, %v255_v36 }
 0x13c   :  { %v252_v38 = vpop.f32.mrf.mxu1 }
 0x13d   :  { %333 = vmatmul.bf16.vlgmr.msra.gmra.mxu2 %v273_v37 }
 0x1c0   :  { %v334_v40 = vpop.f32.mrf.mxu2 }
 0x1c1   :  { %v335_v41 = vadd.f32 %v487_v39, %v334_v40 }
 0x1c3   :  { %338 = vst [vmem:[#allocation10] sm:$0xff] %v335_v41 }
 0x1c4   :  { %349 = dma.vmem_to_hbm [thread:$0]  %s345_s25, 128, %s347_s28, [#allocation4]  }
 0x1c8   :  { %v336_v42 = vpop.f32.mrf.mxu2 }
 0x1c9   :  { %614 = dma.done.wait [#allocation4], 128  }
 0x1ca   :  { %615 = vsyncadd [#allocation4], 4294967168 }
 0x1cb   :  { %354 = vsyncpa [#allocation3], 1 }
 0x1cc   :  { %355 = vsyncpa [#allocation6], 1 }
 0x1cd   :  { %356 = vsyncpa [#allocation9], 1 }
 0x1ce   :  { %357 = vsyncpa [#allocation4], 1 }

</bundles_post_ra>
